<compile_context>
chip_gen: v7x
topology: tpu7x:2x2x1
jax: 0.10.0
libtpu: 0.0.40
codegen_flags: <defaults>
</compile_context>

<pallas_src>
import functools
import math

import jax
import jax.numpy as jnp
import numpy as np
from jax.experimental import pallas as pl
from jax.experimental.pallas import tpu as pltpu


def _fourier_kernel(x_ref, scale_ref, phase_ref, o_ref, *, n_rep):
    """One batch tile: o = sin([x|x|...|x] * scale + phase), one full-width store."""
    x = x_ref[...].astype(jnp.float32)               # (tb, D); f32 compute (v5e EUP has no bf16)
    xw = jnp.concatenate([x] * n_rep, axis=-1)       # (tb, 2K) lane-dense block
    feats = xw * scale_ref[...] + phase_ref[...]     # pi*2**p * x (+ pi/2 on the cos half)
    o_ref[...] = jnp.sin(feats).astype(o_ref.dtype)  # single lane-dense store


def _choose_tile_rows(batch, input_dim, width, out_itemsize,
                      tile_budget_bytes, max_tile_rows):
    # Per batch row of VMEM: double-buffered input + output tiles plus ~3
    # full-width f32 intermediates (replicated x, feats, pre-cast sin result).
    row_bytes = 2 * input_dim * 4 + 2 * width * out_itemsize + 3 * width * 4
    tb = max(8, tile_budget_bytes // row_bytes)
    # v7x megacore: give the "parallel" grid axis >=2 (>=4 for big batches)
    # blocks so both TensorCores get work -- but only once the batch is large
    # enough that the ~0.35us per-grid-step overhead is negligible.
    if batch >= 4096:
        tb = min(tb, pl.cdiv(batch, 4))
    elif batch >= 1024:
        tb = min(tb, pl.cdiv(batch, 2))
    if max_tile_rows is not None:
        tb = min(tb, max_tile_rows)
    if tb >= batch:
        return batch                       # single full-extent block: always legal
    return max(8, (tb // 8) * 8)           # partial blocks need sublane multiples


def fourier_features(x, min_power=1, max_power=4, out_dtype=None,
                     tile_budget_bytes=20 * 1024 * 1024, max_tile_rows=None):
    """Pallas TPU forward of FourierFeaturesLayer.

    x: (batch, ...) flattened to (batch, input_dim).
    Returns (batch, 2 * n_powers * input_dim) = [cos(pi*x@B.T) | sin(pi*x@B.T)].
    out_dtype: defaults to x.dtype; pass jnp.bfloat16 to halve HBM writeback.
    """
    batch = x.shape[0]
    x_flat = x.reshape(batch, -1)
    input_dim = x_flat.shape[1]
    n_powers = max_power - min_power + 1
    K = n_powers * input_dim
    width = 2 * K
    out_dtype = jnp.dtype(x_flat.dtype if out_dtype is None else out_dtype)

    # (1, 2K) per-column scale / phase rows.  Column k*input_dim + d gets
    # scale = pi * 2**(min_power + k % n_powers); phase = pi/2 for the cos
    # half (cos(t) = sin(t + pi/2)) and 0 for the sin half.
    scales = math.pi * (2.0 ** np.arange(min_power, max_power + 1, dtype=np.float64))
    scale_row = jnp.asarray(
        np.tile(np.repeat(scales, input_dim), 2).astype(np.float32)[None, :])
    phase_row = jnp.asarray(
        np.concatenate([np.full((K,), math.pi / 2.0),
                        np.zeros((K,))]).astype(np.float32)[None, :])

    tb = _choose_tile_rows(batch, input_dim, width, out_dtype.itemsize,
                           tile_budget_bytes, max_tile_rows)
    # Partial last block: OOB reads are don't-care, OOB writes are masked by
    # Pallas, so no jnp.pad of x and no out[:batch] slice is needed.
    grid = (pl.cdiv(batch, tb),)

    # Explicit scoped-VMEM limit covering double-buffered tiles + intermediates
    # (floor 32 MiB, cap 48 MiB so it fits every generation incl. v7x's 64 MiB).
    row_bytes = 2 * input_dim * 4 + 2 * width * out_dtype.itemsize + 3 * width * 4
    need = tb * row_bytes + 8 * width * 4 + (1 << 20)
    vmem_limit = int(min(max(need * 3 // 2, 32 * 1024 * 1024), 48 * 1024 * 1024))

    # NOTE: for the demo config the output width is 128 (lane-dense, unmasked
    # stores).  For widths that are not multiples of 128 the block still equals
    # the full last dim (always legal), just with masked partial stores.
    return pl.pallas_call(
        functools.partial(_fourier_kernel, n_rep=2 * n_powers),
        out_shape=jax.ShapeDtypeStruct((batch, width), out_dtype),
        grid=grid,
        in_specs=[
            pl.BlockSpec((tb, input_dim), lambda i: (i, 0)),
            pl.BlockSpec((1, width), lambda i: (0, 0)),   # scale row (tiny)
            pl.BlockSpec((1, width), lambda i: (0, 0)),   # phase row (tiny)
        ],
        out_specs=pl.BlockSpec((tb, width), lambda i: (i, 0)),
        compiler_params=pltpu.CompilerParams(
            dimension_semantics=("parallel",),
            vmem_limit_bytes=vmem_limit),
    )(x_flat, scale_row, phase_row)


if __name__ == "__main__":
    min_power, max_power = 1, 4

    def reference(x):
        # Mirrors the PyTorch module (explicit B matmul).  HIGHEST precision so
        # the f32 matmul with power-of-two identity blocks is exact.
        b = x.shape[0]
        xf = x.reshape(b, -1).astype(jnp.float32)
        d = xf.shape[1]
        B = jnp.concatenate(
            [jnp.eye(d, dtype=jnp.float32) * (2.0 ** p)
             for p in range(min_power, max_power + 1)], axis=0)        # (K, D)
        feats = np.float32(math.pi) * jnp.dot(
            xf, B.T, precision=jax.lax.Precision.HIGHEST)
        return jnp.concatenate([jnp.cos(feats), jnp.sin(feats)], axis=-1)

    key = jax.random.PRNGKey(0)
    k1, k2 = jax.random.split(key)

    # cos(t) is evaluated in-kernel as sin(t + pi/2); at |t| up to
    # pi * 2**max_power * |x| this costs a few f32 ulps of the (large)
    # argument, so compare at 1e-4 rather than 1e-5.
    tol = dict(atol=1e-4, rtol=1e-4)

    # Case 1: module-like small shape (input_dim=16, powers 1..4 -> width 128),
    # single full-batch block.
    x1 = jax.random.normal(k1, (8, 4, 4), dtype=jnp.float32)
    out1 = jax.block_until_ready(fourier_features(x1, min_power, max_power))
    ref1 = reference(x1)
    assert out1.shape == ref1.shape, (out1.shape, ref1.shape)
    assert jnp.allclose(out1, ref1, **tol), float(jnp.max(jnp.abs(out1 - ref1)))

    # Case 2: batch not divisible by the tile -> multi-block "parallel" grid
    # with a masked partial last block (no pad, no out[:batch] slice).
    x2 = jax.random.normal(k2, (100, 4, 4), dtype=jnp.float32)
    out2 = jax.block_until_ready(
        fourier_features(x2, min_power, max_power, max_tile_rows=32))
    ref2 = reference(x2)
    assert out2.shape == ref2.shape, (out2.shape, ref2.shape)
    assert jnp.allclose(out2, ref2, **tol), float(jnp.max(jnp.abs(out2 - ref2)))

    print("KERNEL_OK")
</pallas_src>

<mosaic_0001>
module attributes {stable_mosaic.version = 11 : i64} {
  func.func @_fourier_kernel(%arg0: i32, %arg1: memref<8x16xf32, #tpu.memory_space<vmem>>, %arg2: memref<1x128xf32, #tpu.memory_space<vmem>>, %arg3: memref<1x128xf32, #tpu.memory_space<vmem>>, %arg4: memref<8x128xf32, #tpu.memory_space<vmem>>) attributes {dimension_semantics = [#tpu.dimension_semantics<parallel>], iteration_bounds = array<i64: 1>, scalar_prefetch = 0 : i64, scratch_operands = 0 : i64, tpu.core_type = #tpu.core_type<tc>, window_params = [{transform_indices = @transform_0, window_bounds = array<i64: 8, 16>}, {pipeline_mode = #tpu.pipeline_mode<synchronous>, transform_indices = @transform_1, window_bounds = array<i64: 1, 128>}, {pipeline_mode = #tpu.pipeline_mode<synchronous>, transform_indices = @transform_2, window_bounds = array<i64: 1, 128>}, {transform_indices = @transform_3, window_bounds = array<i64: 8, 128>}]} {
    %c0 = arith.constant 0 : index
    %c0_0 = arith.constant 0 : index
    %0 = vector.load %arg1[%c0, %c0_0] : memref<8x16xf32, #tpu.memory_space<vmem>>, vector<8x16xf32>
    %1 = tpu.concatenate %0, %0, %0, %0, %0, %0, %0, %0 in 1 : vector<8x16xf32>, vector<8x16xf32>, vector<8x16xf32>, vector<8x16xf32>, vector<8x16xf32>, vector<8x16xf32>, vector<8x16xf32>, vector<8x16xf32> -> vector<8x128xf32>
    %c0_1 = arith.constant 0 : index
    %c0_2 = arith.constant 0 : index
    %2 = vector.load %arg2[%c0_1, %c0_2] : memref<1x128xf32, #tpu.memory_space<vmem>>, vector<1x128xf32>
    %3 = vector.broadcast %2 : vector<1x128xf32> to vector<8x128xf32>
    %4 = arith.mulf %1, %3 : vector<8x128xf32>
    %c0_3 = arith.constant 0 : index
    %c0_4 = arith.constant 0 : index
    %5 = vector.load %arg3[%c0_3, %c0_4] : memref<1x128xf32, #tpu.memory_space<vmem>>, vector<1x128xf32>
    %6 = vector.broadcast %5 : vector<1x128xf32> to vector<8x128xf32>
    %7 = arith.addf %4, %6 : vector<8x128xf32>
    %8 = math.sin %7 : vector<8x128xf32>
    %c0_5 = arith.constant 0 : index
    %c0_6 = arith.constant 0 : index
    %9 = vector.load %arg4[%c0_5, %c0_6] : memref<8x128xf32, #tpu.memory_space<vmem>>, vector<8x128xf32>
    tpu.vector_store %arg4[%c0_5, %c0_6], %8 {strides = array<i32>} : memref<8x128xf32, #tpu.memory_space<vmem>>, vector<8x128xf32>,
    return
  }
  func.func @transform_0(%arg0: i32) -> (i32, i32) {
    %c0_i32 = arith.constant 0 : i32
    %c0_i32_0 = arith.constant 0 : i32
    return %arg0, %c0_i32 : i32, i32
  }
  func.func @transform_1(%arg0: i32) -> (i32, i32) {
    %c0_i32 = arith.constant 0 : i32
    %c0_i32_0 = arith.constant 0 : i32
    %c0_i32_1 = arith.constant 0 : i32
    return %c0_i32, %c0_i32_0 : i32, i32
  }
  func.func @transform_2(%arg0: i32) -> (i32, i32) {
    %c0_i32 = arith.constant 0 : i32
    %c0_i32_0 = arith.constant 0 : i32
    %c0_i32_1 = arith.constant 0 : i32
    return %c0_i32, %c0_i32_0 : i32, i32
  }
  func.func @transform_3(%arg0: i32) -> (i32, i32) {
    %c0_i32 = arith.constant 0 : i32
    %c0_i32_0 = arith.constant 0 : i32
    return %arg0, %c0_i32 : i32, i32
  }
}

</mosaic_0001>

<bundles_post_ra>
// kernel: tpu_custom_call.1
= control target key start
LH: loop header
LB: loop body
LE: loop exit
PB: predicated region body
PF: predicated region fallthrough
CT: control target
= control target key end

     0   :  { %8 = vsyncpa [#allocation3], 0  ;;  %s363_s0 = inlined_call_operand.hbm [shape: f32[8,16], index: 0, kind: input, shape index: {}]   ;;  %s364_s1 = inlined_call_operand.vmem [shape: f32[1,128], index: 1, kind: input, shape index: {}]   ;;  %s365_s2 = inlined_call_operand.vmem [shape: f32[1,128], index: 2, kind: input, shape index: {}]   ;;  %s366_s3 = inlined_call_operand.hbm [shape: f32[8,128], index: 3, kind: output, shape index: {}]  }
   0x1   :  { %9 = vsyncpa [#allocation4], 0  ;;  %s277_s12 = smov [#allocation2]   ;;  %s229_s16 = scalar_lea.hbm %s363_s0, 128 }
   0x2   :  { %s16_s13 = sshll.u32 %s277_s12, 4  ;;  %p230_p0 = scmp.ne.s32.totalorder %s363_s0, %s229_s16  ;;  %s17_s13 = int_to_ptr.vmem [resolvable:$true] %s16_s13 }
   0x3   :  { %p233_p1 = scmp.lt.u32.totalorder %s229_s16, %s363_s0 }
   0x5   :  { %p235_p2 = pnand %p233_p1, %p230_p0 }
   0x7   :  { %238 = shalt.err (!%p235_p2)
}
   0x8   :  { %s239_s21 = scalar_lea.vmem %s17_s13, 128  ;;  %p244_p4 = scmp.lt.s32.totalorder %s17_s13, %s17_s13 }
   0x9   :  { %p240_p3 = scmp.ne.s32.totalorder %s17_s13, %s239_s21  ;;  %p245_p5 = scmp.lt.s32.totalorder %s239_s21, %s239_s21 }
   0xb   :  { %p246_p6 = por %p245_p5, %p244_p4 }
   0xd   :  { %p247_p7 = pnand %p246_p6, %p240_p3 }
   0xf   :  { %250 = shalt.err (!%p247_p7)
}
  0x10   :  { %19 = dma.hbm_to_vmem [thread:$0]  %s363_s0, 128, %s17_s13, [#allocation3]  }
  0x11   :  { %273 = dma.done.wait [#allocation3], 128  }
  0x12   :  { %274 = vsyncadd [#allocation3], 4294967168  ;;  %v27_v0 = vld [vmem:[#allocation2] sm:$0xff]  ;;  %s278_s24 = smov 16   ;;  %s279_s25 = smov 48   ;;  %vm50_vm0 = vcmask 130048  }
  0x13   :  { %29 = vrot.lane.b32.xlu0 %v27_v0, %s278_s24  ;;  %35 = vrot.lane.b32.xlu1 %v27_v0, %s279_s25  ;;  %s280_s26 = smov 32   ;;  %s281_s27 = smov 64   ;;  %vm52_vm1 = vcmask 261120   ;;  %vm54_vm2 = vcmask 392192   ;;  %vm56_vm3 = vcmask 523264   ;;  %vm58_vm4 = vcmask 654336  }
  0x14   :  { %s282_s28 = smov 80   ;;  %s283_s29 = smov 96   ;;  %vm60_vm5 = vcmask 785408   ;;  %vm62_vm6 = vcmask 916480   ;;  %v200_v12 = vld [vmem:[%s364_s1] ss:$0 sm:$0xff] }
  0x15   :  { %s284_s30 = smov 112   ;;  %v201_v15 = vld [vmem:[%s365_s2] ss:$0 sm:$0xff]  ;;  %v285_v29 = vmov 683565275   ;;  %s291_s1 = smov [#allocation5]  }
  0x16   :  { %v286_v31 = vmov 2475754826   ;;  %v287_v34 = vmov 2131351028   ;;  %v288_v37 = vmov 2102212464  }
  0x17   :  { %32 = vrot.lane.b32.xlu0 %v27_v0, %s280_s26  ;;  %38 = vrot.lane.b32.xlu1 %v27_v0, %s281_s27  ;;  %v289_v40 = vmov 920167782   ;;  %v290_v43 = vmov 1326507024   ;;  %s191_s2 = sshll.u32 %s291_s1, 4  ;;  %s192_s2 = int_to_ptr.vmem [resolvable:$true] %s191_s2 }
  0x18   :  { %s251_s7 = scalar_lea.vmem %s192_s2, 128  ;;  %p256_p9 = scmp.lt.s32.totalorder %s192_s2, %s192_s2 }
  0x19   :  { %p252_p8 = scmp.ne.s32.totalorder %s192_s2, %s251_s7  ;;  %p257_p10 = scmp.lt.s32.totalorder %s251_s7, %s251_s7 }
  0x1b   :  { %41 = vrot.lane.b32.xlu0 %v27_v0, %s282_s28  ;;  %44 = vrot.lane.b32.xlu1 %v27_v0, %s283_s29  ;;  %p258_p11 = por %p257_p10, %p256_p9 }
  0x1d   :  { %p259_p12 = pnand %p258_p11, %p252_p8 }
  0x1f   :  { %47 = vrot.lane.b32.xlu0 %v27_v0, %s284_s30 }
  0x85   :  { %v30_v1 = vpop.permute.xlu0 %29  ;;  %v36_v2 = vpop.permute.xlu1 %35 }
  0x86   :  { %v51_v3 = vsel %vm50_vm0, %v27_v0, %v30_v1 }
  0x89   :  { %v33_v4 = vpop.permute.xlu0 %32  ;;  %v39_v5 = vpop.permute.xlu1 %38 }
  0x8a   :  { %v53_v6 = vsel %vm52_vm1, %v51_v3, %v33_v4 }
  0x8b   :  { %v55_v7 = vsel %vm54_vm2, %v53_v6, %v36_v2 }
  0x8c   :  { %v57_v8 = vsel %vm56_vm3, %v55_v7, %v39_v5 }
  0x8d   :  { %v42_v9 = vpop.permute.xlu0 %41  ;;  %v45_v11 = vpop.permute.xlu1 %44 }
  0x8e   :  { %v59_v10 = vsel %vm58_vm4, %v57_v8, %v42_v9 }
  0x8f   :  { %v61_v13 = vsel %vm60_vm5, %v59_v10, %v45_v11 }
  0x91   :  { %v48_v14 = vpop.permute.xlu0 %47 }
  0x92   :  { %v63_v16 = vsel %vm62_vm6, %v61_v13, %v48_v14 }
  0x93   :  { %v71_v17 = vmul.f32 %v200_v12, %v63_v16 }
  0x95   :  { %v330_v18 = vadd.f32 %v201_v15, %v71_v17 }
  0x97   :  { %v83_v19 = vand.u32 2139095040, %v330_v18  ;;  %v80_v23 = vand.u32 2147483647, %v330_v18  ;;  %vm82_vm14 = vcmp.lt.s32.totalorder %v330_v18, 0  ;;  %vm172_vm3 = vweird.f32 %v330_v18 }
  0x99   :  { %v84_v20 = vshrl.u32 %v83_v19, 23  ;;  %v87_v27 = vand.u32 8388607, %v80_v23  ;;  %vm81_vm15 = vcmp.le.f32.partialorder %v80_v23, 0.7853982 }
  0x9b   :  { %v202_v21 = vadd.s32 4294967169, %v84_v20  ;;  %v88_v45 = vor.u32 8388608, %v87_v27 }
  0x9d   :  { %v90_v22 = vadd.s32 1, %v202_v21  ;;  %v128_v59 = vshll.u32 %v88_v45, 8 }
  0x9f   :  { %vm91_vm7 = vcmp.gt.s32.totalorder %v90_v22, 0 }
  0xa0   :  { %v92_v24 = vsel %vm91_vm7, %v90_v22, 0 }
  0xa1   :  { %v94_v25 = vand.u32 31, %v92_v24  ;;  %v93_v28 = vshrl.u32 %v92_v24, 5 }
  0xa3   :  { %v95_v26 = vsub.s32 32, %v94_v25  ;;  %v97_v30 = vshll.u32 %v285_v29, %v94_v25  ;;  %v100_v32 = vshll.u32 %v286_v31, %v94_v25  ;;  %v103_v36 = vshll.u32 %v287_v34, %v94_v25 }
  0xa4   :  { %v106_v39 = vshll.u32 %v288_v37, %v94_v25  ;;  %v109_v42 = vshll.u32 %v289_v40, %v94_v25  ;;  %vm112_vm8 = vcmp.lt.s32.totalorder %v93_v28, 1  ;;  %vm115_vm9 = vcmp.lt.s32.totalorder %v93_v28, 4 }
  0xa5   :  { %v98_v33 = vshrl.u32 %v286_v31, %v95_v26  ;;  %v101_v35 = vshrl.u32 %v287_v34, %v95_v26  ;;  %v104_v38 = vshrl.u32 %v288_v37, %v95_v26  ;;  %v107_v41 = vshrl.u32 %v289_v40, %v95_v26 }
  0xa6   :  { %v110_v44 = vshrl.u32 %v290_v43, %v95_v26  ;;  %v96_v54 = vshrl.u32 %v285_v29, %v95_v26  ;;  %vm114_vm10 = vcmp.lt.s32.totalorder %v93_v28, 3  ;;  %vm113_vm11 = vcmp.lt.s32.totalorder %v93_v28, 2 }
  0xa7   :  { %v99_v46 = vor.u32 %v98_v33, %v97_v30  ;;  %v102_v47 = vor.u32 %v101_v35, %v100_v32  ;;  %v105_v48 = vor.u32 %v104_v38, %v103_v36  ;;  %v108_v49 = vor.u32 %v107_v41, %v106_v39 }
  0xa8   :  { %v111_v50 = vor.u32 %v110_v44, %v109_v42 }
  0xa9   :  { %v117_v51 = vsel %vm115_vm9, %v105_v48, 2102212464  ;;  %v120_v52 = vsel %vm112_vm8, %v99_v46, %v102_v47  ;;  %v124_v53 = vsel %vm112_vm8, %v102_v47, %v105_v48  ;;  %v121_v55 = vsel %vm115_vm9, %v108_v49, 920167782 }
  0xaa   :  { %v125_v56 = vsel %vm115_vm9, %v111_v50, 1326507024  ;;  %v122_v57 = vsel %vm114_vm10, %v105_v48, %v121_v55  ;;  %v116_v60 = vsel %vm112_vm8, %v96_v54, %v99_v46  ;;  %v118_v61 = vsel %vm114_vm10, %v102_v47, %v117_v51 }
  0xab   :  { %v126_v58 = vsel %vm114_vm10, %v108_v49, %v125_v56  ;;  %v123_v62 = vsel %vm113_vm11, %v120_v52, %v122_v57  ;;  %v119_v4 = vsel %vm113_vm11, %v116_v60, %v118_v61 }
  0xac   :  { %v127_v63 = vsel %vm113_vm11, %v124_v53, %v126_v58  ;;  %v339_v2 = vmul.u32.u64.low %v128_v59, %v123_v62  ;;  %v340_v3 = vmul.u32.u64.high %v128_v59, %v123_v62, %v339_v2  ;;  %v135_v6 = vmul.u32 %v128_v59, %v119_v4 }
  0xad   :  { %v336_v0 = vmul.u32.u64.low %v128_v59, %v127_v63  ;;  %v337_v1 = vmul.u32.u64.high %v128_v59, %v127_v63, %v336_v0 }
  0xae   :  { %v138_v5 = vadd.s32 1, %v340_v3 }
  0xaf   :  { %vm137_vm12 = vc.u32 %v337_v1, %v339_v2  ;;  %v136_v19 = vadd.s32 %v339_v2, %v337_v1 }
  0xb0   :  { %v139_v7 = vsel %vm137_vm12, %v138_v5, %v340_v3 }
  0xb1   :  { %v140_v8 = vadd.s32 %v139_v7, %v135_v6 }
  0xb3   :  { %v141_v9 = vadd.s32 536870912, %v140_v8 }
  0xb5   :  { %v142_v10 = vshrl.u32 %v141_v9, 30 }
  0xb7   :  { %v143_v11 = vshll.u32 %v142_v10, 30  ;;  %v166_v32 = vsub.s32 4, %v142_v10 }
  0xb9   :  { %v144_v12 = vsub.s32 %v140_v8, %v143_v11  ;;  %v167_v35 = vsel %vm82_vm14, %v166_v32, %v142_v10 }
  0xba   :  { %v169_v37 = vsel %vm81_vm15, 0, %v167_v35 }
  0xbb   :  { %v146_v13 = vsub.s32 0, %v144_v12  ;;  %v173_v38 = vadd.s32 3, %v169_v37 }
  0xbd   :  { %v203_v14 = vmin.u32 %v146_v13, %v144_v12  ;;  %v174_v39 = vand.u32 3, %v173_v38 }
  0xbf   :  { %v148_v15 = vclz %v203_v14  ;;  %vm179_vm0 = vcmp.eq.s32.totalorder %v174_v39, 2  ;;  %vm176_vm1 = vcmp.eq.s32.totalorder %v174_v39, 0  ;;  %vm175_vm2 = vcmp.lt.s32.totalorder %v174_v39, 2 }
  0xc1   :  { %v204_v16 = vadd.s32 4294967294, %v148_v15 }
  0xc3   :  { %vm205_vm13 = vcmp.lt.s32.totalorder %v204_v16, 0 }
  0xc4   :  { %v151_v17 = vsel %vm205_vm13, 0, %v204_v16 }
  0xc5   :  { %v152_v20 = vsub.s32 32, %v151_v17  ;;  %v156_v21 = vsub.s32 4294967266, %v151_v17  ;;  %v153_v22 = vshll.u32 %v144_v12, %v151_v17 }
  0xc7   :  { %v154_v24 = vshrl.u32 %v136_v19, %v152_v20  ;;  %v157_v25 = vadd.s32 127, %v156_v21 }
  0xc9   :  { %v155_v26 = vor.u32 %v154_v24, %v153_v22  ;;  %v158_v27 = vshll.u32 %v157_v25, 23 }
  0xcb   :  { %v159_v28 = vor.u32 4788187, %v158_v27  ;;  %v162_v30 = vcvt.s32.f32 %v155_v26 }
  0xcd   :  { %v160_v29 = vand.u32 2147483647, %v159_v28 }
  0xcf   :  { %v163_v31 = vmul.f32 %v162_v30, %v160_v29 }
  0xd1   :  { %v164_v33 = vxor.u32 2147483648, %v163_v31 }
  0xd3   :  { %v165_v34 = vsel %vm82_vm14, %v164_v33, %v163_v31 }
  0xd4   :  { %v168_v36 = vsel %vm81_vm15, %v330_v18, %v165_v34 }
  0xd5   :  { %225 = vcosq.f32 %v168_v36 }
  0xd6   :  { %227 = vsinq.f32 %v168_v36 }
  0xdf   :  { %v226_v40 = vpop.eup %225 }
  0xe0   :  { %v228_v41 = vpop.eup %227  ;;  %v180_v42 = vxor.u32 2147483648, %v226_v40 }
  0xe1   :  { %v177_v43 = vxor.u32 2147483648, %v228_v41 }
  0xe2   :  { %v181_v44 = vsel %vm179_vm0, %v180_v42, %v228_v41 }
  0xe3   :  { %v178_v23 = vsel %vm176_vm1, %v226_v40, %v177_v43 }
  0xe4   :  { %v182_v45 = vsel %vm175_vm2, %v178_v23, %v181_v44 }
  0xe5   :  { %v183_v46 = vsel %vm172_vm3, nan, %v182_v45 }
  0xe6   :  { %184 = vst [vmem:[#allocation5] sm:$0xff] %v183_v46 }
  0xe7   :  { %262 = shalt.err (!%p259_p12)
}
  0xe8   :  { %s263_s10 = scalar_lea.hbm %s366_s3, 128 }
  0xe9   :  { %p264_p13 = scmp.ne.s32.totalorder %s366_s3, %s263_s10  ;;  %p267_p0 = scmp.lt.u32.totalorder %s263_s10, %s366_s3 }
  0xeb   :  { %p269_p1 = pnand %p267_p0, %p264_p13 }
  0xed   :  { %272 = shalt.err (!%p269_p1)
}
  0xee   :  { %194 = dma.vmem_to_hbm [thread:$0]  %s192_s2, 128, %s366_s3, [#allocation4]  }
  0xef   :  { %275 = dma.done.wait [#allocation4], 128  }
  0xf0   :  { %276 = vsyncadd [#allocation4], 4294967168 }
  0xf1   :  { %198 = vsyncpa [#allocation3], 1 }
  0xf2   :  { %199 = vsyncpa [#allocation4], 1 }

</bundles_post_ra>
